<compile_context>
chip_gen: v5e
topology: v5e:2x2
jax: 0.10.0
libtpu: 0.0.40
codegen_flags: <defaults>
</compile_context>

<pallas_src>
import jax
import jax.numpy as jnp
from jax.experimental import pallas as pl
from jax.experimental.pallas import tpu as pltpu


LANE = 128      # lane width: pad the tiny (N_action^2) output to a dense slab
SUBLANE = 8     # f32 sublane granularity for the batch tile


def _round_up(n, m):
    return ((n + m - 1) // m) * m


def critic_kernel(s1_ref, s2_ref, w1a_ref, w1b_ref, b1_ref,
                  w2_ref, b2_ref, w3_ref, b3_ref, o_ref):
    # Fused concat: split the first matmul over the two observation halves.
    s1 = s1_ref[...].astype(jnp.bfloat16)
    s2 = s2_ref[...].astype(jnp.bfloat16)

    h1 = (jnp.dot(s1, w1a_ref[...], preferred_element_type=jnp.float32)
          + jnp.dot(s2, w1b_ref[...], preferred_element_type=jnp.float32)
          + b1_ref[...])
    h1 = jnp.maximum(h1, 0.0)                                   # f32 VPU relu

    h2 = jnp.dot(h1.astype(jnp.bfloat16), w2_ref[...],
                 preferred_element_type=jnp.float32) + b2_ref[...]
    h2 = jnp.maximum(h2, 0.0)

    out = jnp.dot(h2.astype(jnp.bfloat16), w3_ref[...],
                  preferred_element_type=jnp.float32) + b3_ref[...]
    o_ref[...] = out                                            # (TM, 128) dense store


def critic_get_value(s1, s2, params, *, tm=512):
    """s1, s2: (B, obs_size) float32.  Returns (B, N_action*N_action) float32."""
    w1, b1, w2, b2, w3, b3 = params
    B, obs = s1.shape
    out_dim = w3.shape[1]

    # Weight prep (one-time, tiny): bf16 for the MXU, W1 split to fuse the
    # concat, final layer padded to a lane-dense (128-wide) output slab.
    w1a = w1[:obs].astype(jnp.bfloat16)
    w1b = w1[obs:].astype(jnp.bfloat16)
    w2b = w2.astype(jnp.bfloat16)
    out_pad = _round_up(out_dim, LANE)
    w3p = jnp.pad(w3, ((0, 0), (0, out_pad - out_dim))).astype(jnp.bfloat16)
    b3p = jnp.pad(b3, ((0, 0), (0, out_pad - out_dim)))

    # Batch tiling: never pad a small batch past one sublane tile; for large
    # batches use a big tile (VMEM cost per step is tiny at these widths).
    tm = min(tm, _round_up(B, SUBLANE))
    b_pad = _round_up(B, tm)
    if b_pad != B:
        s1 = jnp.pad(s1, ((0, b_pad - B), (0, 0)))
        s2 = jnp.pad(s2, ((0, b_pad - B), (0, 0)))
    n_blocks = pl.cdiv(b_pad, tm)

    def row_spec(cols):
        return pl.BlockSpec((tm, cols), lambda i: (i, 0))

    def resident(a):
        # Constant block index -> weight/bias stays VMEM-resident across steps.
        return pl.BlockSpec(a.shape, lambda i: (0, 0))

    out = pl.pallas_call(
        critic_kernel,
        out_shape=jax.ShapeDtypeStruct((b_pad, out_pad), jnp.float32),
        grid=(n_blocks,),
        in_specs=[
            row_spec(obs), row_spec(obs),
            resident(w1a), resident(w1b), resident(b1),
            resident(w2b), resident(b2),
            resident(w3p), resident(b3p),
        ],
        out_specs=pl.BlockSpec((tm, out_pad), lambda i: (i, 0)),
        compiler_params=pltpu.CompilerParams(
            dimension_semantics=("parallel",),   # megacore / v7x dual-TC batch split
            vmem_limit_bytes=32 * 1024 * 1024,   # comfortable on v7x (64 MiB physical)
        ),
    )(s1, s2, w1a, w1b, b1, w2b, b2, w3p, b3p)

    return out[:B, :out_dim]


def init_params(key, obs_size, n_action):
    """Deterministic init mirroring nn.Linear shapes (weights kept as (in, out))."""
    in1, h1, h2, out = obs_size * 2, 64, 32, n_action * n_action
    ks = jax.random.split(key, 6)

    def lin(kw, kb, fan_in, fan_out):
        bound = 1.0 / jnp.sqrt(fan_in)
        w = jax.random.uniform(kw, (fan_in, fan_out), jnp.float32, -bound, bound)
        b = jax.random.uniform(kb, (1, fan_out), jnp.float32, -bound, bound)
        return w, b

    w1, b1 = lin(ks[0], ks[1], in1, h1)
    w2, b2 = lin(ks[2], ks[3], h1, h2)
    w3, b3 = lin(ks[4], ks[5], h2, out)
    return (w1, b1, w2, b2, w3, b3)


def reference_forward_bf16(s1, s2, params):
    """Mirrors the kernel numerics: bf16 matmul operands, f32 accumulate/elementwise."""
    w1, b1, w2, b2, w3, b3 = params
    x = jnp.concatenate([s1, s2], axis=-1)

    def mm(a, w):
        a32 = a.astype(jnp.bfloat16).astype(jnp.float32)
        w32 = w.astype(jnp.bfloat16).astype(jnp.float32)
        return jnp.dot(a32, w32, preferred_element_type=jnp.float32)

    h = jnp.maximum(mm(x, w1) + b1, 0.0)
    h = jnp.maximum(mm(h, w2) + b2, 0.0)
    return mm(h, w3) + b3


def reference_forward_f32(s1, s2, params):
    """Pure-f32 reference matching the original PyTorch module semantics."""
    w1, b1, w2, b2, w3, b3 = params
    x = jnp.concatenate([s1, s2], axis=-1)
    h = jnp.maximum(x @ w1 + b1, 0.0)
    h = jnp.maximum(h @ w2 + b2, 0.0)
    return h @ w3 + b3


if __name__ == "__main__":
    obs_size = 16     # per-agent observation size
    n_action = 4      # -> output dim N_action * N_action = 16
    batch = 2

    key = jax.random.PRNGKey(0)
    k_params, k_s1, k_s2 = jax.random.split(key, 3)

    params = init_params(k_params, obs_size, n_action)

    # get_value(s1, s2): concatenation is fused inside the kernel.
    s1 = jax.random.normal(k_s1, (batch, obs_size), jnp.float32)
    s2 = jax.random.normal(k_s2, (batch, obs_size), jnp.float32)

    out = critic_get_value(s1, s2, params)
    out = jax.block_until_ready(out)

    assert out.shape == (batch, n_action * n_action)

    # Bitwise-equivalent-numerics reference (bf16 operands, f32 accumulate).
    ref_bf16 = reference_forward_bf16(s1, s2, params)
    assert jnp.allclose(out, ref_bf16, atol=2e-4, rtol=2e-4), "mismatch vs bf16 reference"

    # Semantic sanity check vs the pure-f32 PyTorch-equivalent forward.
    ref_f32 = reference_forward_f32(s1, s2, params)
    assert jnp.allclose(out, ref_f32, atol=5e-2, rtol=5e-2), "mismatch vs f32 reference"

    print("KERNEL_OK")
</pallas_src>

<mosaic_0001>
module attributes {stable_mosaic.version = 11 : i64} {
  func.func @critic_kernel(%arg0: i32, %arg1: memref<8x16xf32, #tpu.memory_space<vmem>>, %arg2: memref<8x16xf32, #tpu.memory_space<vmem>>, %arg3: memref<16x64xbf16, #tpu.memory_space<vmem>>, %arg4: memref<16x64xbf16, #tpu.memory_space<vmem>>, %arg5: memref<1x64xf32, #tpu.memory_space<vmem>>, %arg6: memref<64x32xbf16, #tpu.memory_space<vmem>>, %arg7: memref<1x32xf32, #tpu.memory_space<vmem>>, %arg8: memref<32x128xbf16, #tpu.memory_space<vmem>>, %arg9: memref<1x128xf32, #tpu.memory_space<vmem>>, %arg10: memref<8x128xf32, #tpu.memory_space<vmem>>) attributes {dimension_semantics = [#tpu.dimension_semantics<parallel>], iteration_bounds = array<i64: 1>, scalar_prefetch = 0 : i64, scratch_operands = 0 : i64, tpu.core_type = #tpu.core_type<tc>, window_params = [{transform_indices = @transform_0, window_bounds = array<i64: 8, 16>}, {transform_indices = @transform_1, window_bounds = array<i64: 8, 16>}, {pipeline_mode = #tpu.pipeline_mode<synchronous>, transform_indices = @transform_2, window_bounds = array<i64: 16, 64>}, {pipeline_mode = #tpu.pipeline_mode<synchronous>, transform_indices = @transform_3, window_bounds = array<i64: 16, 64>}, {pipeline_mode = #tpu.pipeline_mode<synchronous>, transform_indices = @transform_4, window_bounds = array<i64: 1, 64>}, {pipeline_mode = #tpu.pipeline_mode<synchronous>, transform_indices = @transform_5, window_bounds = array<i64: 64, 32>}, {pipeline_mode = #tpu.pipeline_mode<synchronous>, transform_indices = @transform_6, window_bounds = array<i64: 1, 32>}, {pipeline_mode = #tpu.pipeline_mode<synchronous>, transform_indices = @transform_7, window_bounds = array<i64: 32, 128>}, {pipeline_mode = #tpu.pipeline_mode<synchronous>, transform_indices = @transform_8, window_bounds = array<i64: 1, 128>}, {transform_indices = @transform_9, window_bounds = array<i64: 8, 128>}]} {
    %c0 = arith.constant 0 : index
    %c0_0 = arith.constant 0 : index
    %0 = vector.load %arg1[%c0, %c0_0] : memref<8x16xf32, #tpu.memory_space<vmem>>, vector<8x16xf32>
    %1 = arith.truncf %0 : vector<8x16xf32> to vector<8x16xbf16>
    %c0_1 = arith.constant 0 : index
    %c0_2 = arith.constant 0 : index
    %2 = vector.load %arg2[%c0_1, %c0_2] : memref<8x16xf32, #tpu.memory_space<vmem>>, vector<8x16xf32>
    %3 = arith.truncf %2 : vector<8x16xf32> to vector<8x16xbf16>
    %c0_3 = arith.constant 0 : index
    %c0_4 = arith.constant 0 : index
    %4 = vector.load %arg3[%c0_3, %c0_4] : memref<16x64xbf16, #tpu.memory_space<vmem>>, vector<16x64xbf16>
    %cst = arith.constant dense<0.000000e+00> : vector<8x64xf32>
    %5 = tpu.matmul %1, %4, %cst {dimension_numbers = #tpu.dot_dimension_numbers<[1], [0], [0], [1], [0, 0, 1, 1], [], []>} : vector<8x16xbf16>, vector<16x64xbf16>, vector<8x64xf32> -> vector<8x64xf32>
    %c0_5 = arith.constant 0 : index
    %c0_6 = arith.constant 0 : index
    %6 = vector.load %arg4[%c0_5, %c0_6] : memref<16x64xbf16, #tpu.memory_space<vmem>>, vector<16x64xbf16>
    %cst_7 = arith.constant dense<0.000000e+00> : vector<8x64xf32>
    %7 = tpu.matmul %3, %6, %cst_7 {dimension_numbers = #tpu.dot_dimension_numbers<[1], [0], [0], [1], [0, 0, 1, 1], [], []>} : vector<8x16xbf16>, vector<16x64xbf16>, vector<8x64xf32> -> vector<8x64xf32>
    %8 = arith.addf %5, %7 : vector<8x64xf32>
    %c0_8 = arith.constant 0 : index
    %c0_9 = arith.constant 0 : index
    %9 = vector.load %arg5[%c0_8, %c0_9] : memref<1x64xf32, #tpu.memory_space<vmem>>, vector<1x64xf32>
    %10 = vector.broadcast %9 : vector<1x64xf32> to vector<8x64xf32>
    %11 = arith.addf %8, %10 : vector<8x64xf32>
    %cst_10 = arith.constant 0.000000e+00 : f32
    %12 = vector.broadcast %cst_10 : f32 to vector<8x64xf32>
    %13 = arith.maximumf %11, %12 : vector<8x64xf32>
    %14 = arith.truncf %13 : vector<8x64xf32> to vector<8x64xbf16>
    %c0_11 = arith.constant 0 : index
    %c0_12 = arith.constant 0 : index
    %15 = vector.load %arg6[%c0_11, %c0_12] : memref<64x32xbf16, #tpu.memory_space<vmem>>, vector<64x32xbf16>
    %cst_13 = arith.constant dense<0.000000e+00> : vector<8x32xf32>
    %16 = tpu.matmul %14, %15, %cst_13 {dimension_numbers = #tpu.dot_dimension_numbers<[1], [0], [0], [1], [0, 0, 1, 1], [], []>} : vector<8x64xbf16>, vector<64x32xbf16>, vector<8x32xf32> -> vector<8x32xf32>
    %c0_14 = arith.constant 0 : index
    %c0_15 = arith.constant 0 : index
    %17 = vector.load %arg7[%c0_14, %c0_15] : memref<1x32xf32, #tpu.memory_space<vmem>>, vector<1x32xf32>
    %18 = vector.broadcast %17 : vector<1x32xf32> to vector<8x32xf32>
    %19 = arith.addf %16, %18 : vector<8x32xf32>
    %cst_16 = arith.constant 0.000000e+00 : f32
    %20 = vector.broadcast %cst_16 : f32 to vector<8x32xf32>
    %21 = arith.maximumf %19, %20 : vector<8x32xf32>
    %22 = arith.truncf %21 : vector<8x32xf32> to vector<8x32xbf16>
    %c0_17 = arith.constant 0 : index
    %c0_18 = arith.constant 0 : index
    %23 = vector.load %arg8[%c0_17, %c0_18] : memref<32x128xbf16, #tpu.memory_space<vmem>>, vector<32x128xbf16>
    %cst_19 = arith.constant dense<0.000000e+00> : vector<8x128xf32>
    %24 = tpu.matmul %22, %23, %cst_19 {dimension_numbers = #tpu.dot_dimension_numbers<[1], [0], [0], [1], [0, 0, 1, 1], [], []>} : vector<8x32xbf16>, vector<32x128xbf16>, vector<8x128xf32> -> vector<8x128xf32>
    %c0_20 = arith.constant 0 : index
    %c0_21 = arith.constant 0 : index
    %25 = vector.load %arg9[%c0_20, %c0_21] : memref<1x128xf32, #tpu.memory_space<vmem>>, vector<1x128xf32>
    %26 = vector.broadcast %25 : vector<1x128xf32> to vector<8x128xf32>
    %27 = arith.addf %24, %26 : vector<8x128xf32>
    %c0_22 = arith.constant 0 : index
    %c0_23 = arith.constant 0 : index
    %28 = vector.load %arg10[%c0_22, %c0_23] : memref<8x128xf32, #tpu.memory_space<vmem>>, vector<8x128xf32>
    tpu.vector_store %arg10[%c0_22, %c0_23], %27 {strides = array<i32>} : memref<8x128xf32, #tpu.memory_space<vmem>>, vector<8x128xf32>,
    return
  }
  func.func @transform_0(%arg0: i32) -> (i32, i32) {
    %c0_i32 = arith.constant 0 : i32
    %c0_i32_0 = arith.constant 0 : i32
    return %arg0, %c0_i32 : i32, i32
  }
  func.func @transform_1(%arg0: i32) -> (i32, i32) {
    %c0_i32 = arith.constant 0 : i32
    %c0_i32_0 = arith.constant 0 : i32
    return %arg0, %c0_i32 : i32, i32
  }
  func.func @transform_2(%arg0: i32) -> (i32, i32) {
    %c0_i32 = arith.constant 0 : i32
    %c0_i32_0 = arith.constant 0 : i32
    %c0_i32_1 = arith.constant 0 : i32
    return %c0_i32, %c0_i32_0 : i32, i32
  }
  func.func @transform_3(%arg0: i32) -> (i32, i32) {
    %c0_i32 = arith.constant 0 : i32
    %c0_i32_0 = arith.constant 0 : i32
    %c0_i32_1 = arith.constant 0 : i32
    return %c0_i32, %c0_i32_0 : i32, i32
  }
  func.func @transform_4(%arg0: i32) -> (i32, i32) {
    %c0_i32 = arith.constant 0 : i32
    %c0_i32_0 = arith.constant 0 : i32
    %c0_i32_1 = arith.constant 0 : i32
    return %c0_i32, %c0_i32_0 : i32, i32
  }
  func.func @transform_5(%arg0: i32) -> (i32, i32) {
    %c0_i32 = arith.constant 0 : i32
    %c0_i32_0 = arith.constant 0 : i32
    %c0_i32_1 = arith.constant 0 : i32
    return %c0_i32, %c0_i32_0 : i32, i32
  }
  func.func @transform_6(%arg0: i32) -> (i32, i32) {
    %c0_i32 = arith.constant 0 : i32
    %c0_i32_0 = arith.constant 0 : i32
    %c0_i32_1 = arith.constant 0 : i32
    return %c0_i32, %c0_i32_0 : i32, i32
  }
  func.func @transform_7(%arg0: i32) -> (i32, i32) {
    %c0_i32 = arith.constant 0 : i32
    %c0_i32_0 = arith.constant 0 : i32
    %c0_i32_1 = arith.constant 0 : i32
    return %c0_i32, %c0_i32_0 : i32, i32
  }
  func.func @transform_8(%arg0: i32) -> (i32, i32) {
    %c0_i32 = arith.constant 0 : i32
    %c0_i32_0 = arith.constant 0 : i32
    %c0_i32_1 = arith.constant 0 : i32
    return %c0_i32, %c0_i32_0 : i32, i32
  }
  func.func @transform_9(%arg0: i32) -> (i32, i32) {
    %c0_i32 = arith.constant 0 : i32
    %c0_i32_0 = arith.constant 0 : i32
    return %arg0, %c0_i32 : i32, i32
  }
}

</mosaic_0001>

<bundles_post_ra>
// kernel: tpu_custom_call.1
= control target key start
LH: loop header
LB: loop body
LE: loop exit
PB: predicated region body
PF: predicated region fallthrough
CT: control target
= control target key end

     0   :  { %vm48_vm0 = vcmask 130048   ;;  %s370_s0 = inlined_call_operand.vmem [shape: f32[8,16], index: 0, kind: input, shape index: {}]   ;;  %s371_s1 = inlined_call_operand.vmem [shape: f32[8,16], index: 1, kind: input, shape index: {}]   ;;  %s372_s2 = inlined_call_operand.vmem [shape: bf16[16,64], index: 2, kind: input, shape index: {}]   ;;  %s373_s3 = inlined_call_operand.vmem [shape: bf16[16,64], index: 3, kind: input, shape index: {}]   ;;  %s374_s4 = inlined_call_operand.vmem [shape: f32[1,64], index: 4, kind: input, shape index: {}]   ;;  %s375_s5 = inlined_call_operand.vmem [shape: bf16[64,32], index: 5, kind: input, shape index: {}]   ;;  %s376_s6 = inlined_call_operand.vmem [shape: f32[1,32], index: 6, kind: input, shape index: {}]   ;;  %s377_s7 = inlined_call_operand.vmem [shape: bf16[32,128], index: 7, kind: input, shape index: {}]   ;;  %s378_s8 = inlined_call_operand.vmem [shape: f32[1,128], index: 8, kind: input, shape index: {}]   ;;  %s379_s9 = inlined_call_operand.hbm [shape: f32[8,128], index: 9, kind: output, shape index: {}]  }
   0x1   :  { %v240_v0 = vld [vmem:[%s373_s3] sm:$0xff]  ;;  %v244_v5 = vld [vmem:[%s375_s5 + $0x18] sm:$0xff]  ;;  %v243_v7 = vld [vmem:[%s375_s5 + $0x10] sm:$0xff] }
   0x2   :  { %v239_v1 = vld [vmem:[%s372_s2] sm:$0xff]  ;;  %59 = vmatpush.bf16.msra.mxu0 %v240_v0  ;;  %138 = vmatpush.bf16.msra.mxu2 %v244_v5 }
   0x3   :  { %v36_v2 = vld [vmem:[%s371_s1] sm:$0xff]  ;;  %81 = vmatpush.bf16.msra.mxu1 %v239_v1 }
   0x4   :  { %v37_v3 = vpack.c.bf16 %v36_v2, %v36_v2  ;;  %v34_v4 = vld [vmem:[%s370_s0] sm:$0xff] }
   0x5   :  { %v35_v6 = vpack.c.bf16 %v34_v4, %v34_v4 }
   0x6   :  { %14 = vsyncpa [#allocation3], 0  ;;  %207 = vmatmul.msk.bf16.vlgmr.msra.gmra.mxu0 %vm48_vm0, %v37_v3  ;;  %139 = vmatpush.bf16.msra.mxu2 %v243_v7  ;;  %v242_v8 = vld [vmem:[%s375_s5 + $0x8] sm:$0xff]  ;;  %v241_v9 = vld [vmem:[%s375_s5] sm:$0xff]  ;;  %vm130_vm1 = vcmask 523264   ;;  %vm169_vm2 = vcmask 261120  }
   0x7   :  { %212 = vmatmul.msk.bf16.vlgmr.msra.gmra.mxu1 %vm48_vm0, %v35_v6  ;;  %v248_v10 = vld [vmem:[%s374_s4] ss:$0 sm:$0xff]  ;;  %v246_v19 = vld [vmem:[%s377_s7 + $0x8] sm:$0xff]  ;;  %s277_s29 = smov [#allocation2]   ;;  %s194_s11 = sshll.u32 %s379_s9, 4  ;;  %s195_s11 = int_to_ptr.hbm [resolvable:$true] %s194_s11 }
   0x8   :  { %179 = vmatpush.bf16.msra.mxu3 %v246_v19  ;;  %v245_v20 = vld [vmem:[%s377_s7] sm:$0xff]  ;;  %s192_s30 = sshll.u32 %s277_s29, 4  ;;  %s193_s30 = int_to_ptr.vmem [resolvable:$true] %s192_s30 }
   0x9   :  { %v249_v21 = vld [vmem:[%s376_s6] ss:$0 sm:$0xff] }
   0xa   :  { %140 = vmatpush.bf16.msra.mxu2 %v242_v8  ;;  %v250_v27 = vld [vmem:[%s378_s8] ss:$0 sm:$0xff] }
   0xc   :  { %180 = vmatpush.bf16.msra.mxu3 %v245_v20 }
   0xe   :  { %141 = vmatpush.bf16.msra.mxu2 %v241_v9 }
  0x83   :  { %v61_v11 = vpop.f32.mrf.mxu0 }
  0x84   :  { %v83_v12 = vpop.f32.mrf.mxu1 }
  0x85   :  { %v84_v13 = vadd.f32 %v83_v12, %v61_v11 }
  0x87   :  { %v91_v14 = vadd.f32 %v248_v10, %v84_v13 }
  0x89   :  { %v92_v15 = vmax.f32 %v91_v14, 0.0 }
  0x8b   :  { %v93_v16 = vpack.c.bf16 %v92_v15, %v92_v15  ;;  %v63_v17 = vpop.f32.mrf.mxu0 }
  0x8c   :  { %v85_v18 = vpop.f32.mrf.mxu1 }
  0x8d   :  { %229 = vmatmul.msk.bf16.vlgmr.msra.gmra.mxu2 %vm130_vm1, %v93_v16 }
 0x110   :  { %v143_v22 = vpop.f32.mrf.mxu2 }
 0x111   :  { %v144_v23 = vadd.f32 %v249_v21, %v143_v22 }
 0x113   :  { %v147_v24 = vmax.f32 %v144_v23, 0.0 }
 0x115   :  { %v148_v25 = vpack.c.bf16 %v147_v24, %v147_v24 }
 0x117   :  { %238 = vmatmul.msk.bf16.vlgmr.msra.gmra.mxu3 %vm169_vm2, %v148_v25 }
 0x118   :  { %v145_v26 = vpop.f32.mrf.mxu2 }
 0x19a   :  { %v182_v28 = vpop.f32.mrf.mxu3 }
 0x19b   :  { %v183_v29 = vadd.f32 %v250_v27, %v182_v28 }
 0x19d   :  { %186 = vst [vmem:[#allocation2] sm:$0xff] %v183_v29 }
 0x19e   :  { %197 = dma.vmem_to_hbm [thread:$0]  %s193_s30, 128, %s195_s11, [#allocation3]  }
 0x1a2   :  { %v184_v30 = vpop.f32.mrf.mxu3 }
 0x1a3   :  { %275 = dma.done.wait [#allocation3], 128  }
 0x1a4   :  { %276 = vsyncadd [#allocation3], 4294967168 }
 0x1a5   :  { %202 = vsyncpa [#allocation3], 1 }

</bundles_post_ra>
